<compile_context>
chip_gen: v7x
topology: tpu7x:2x2x1
jax: 0.10.0
libtpu: 0.0.40
codegen_flags: <defaults>
</compile_context>

<pallas_src>
import functools

import jax
import jax.numpy as jnp
from jax.experimental import pallas as pl
from jax.experimental.pallas import tpu as pltpu

LANE = 128


def _round_up(a, b):
    return ((a + b - 1) // b) * b


def _dilated_residual_kernel(lh_ref, xc_ref, rh_ref, mask_ref,
                             wd_ref, bd_ref, w1_ref, b1_ref, o_ref,
                             *scratch,
                             T, dilation, tT, H, sides_active, compute_dtype):
    C = o_ref.shape[1]
    j = pl.program_id(1)
    t0 = j * tT                         # global time offset of this tile
    cd = compute_dtype

    xc = xc_ref[0]                      # (C, tT) f32: center tap + residual

    if sides_active:
        taps_ref = scratch[0]           # (3C, tT) compute-dtype tap scratch
        s = dilation                    # 1 <= s <= tT (guaranteed by wrapper)

        # ---- left tap  x[t - dilation]  ->  rows [0, C) ---------------------
        # Halo-sourced first s columns: Conv1d zero padding at j == 0,
        # otherwise the last s columns of the left halo block.
        @pl.when(j == 0)
        def _():
            taps_ref[0:C, 0:s] = jnp.zeros((C, s), cd)

        @pl.when(j > 0)
        def _():
            taps_ref[0:C, 0:s] = lh_ref[0, :, H - s:].astype(cd)

        if s < tT:
            # Center-sourced part (lane-shifted slice; XLU relayout when
            # dilation % 128 != 0 — filler under the HBM/MXU-bound main path).
            taps_ref[0:C, s:tT] = xc[:, :tT - s].astype(cd)

        # ---- center tap  x[t]  ->  rows [C, 2C) -----------------------------
        taps_ref[C:2 * C, :] = xc.astype(cd)

        # ---- right tap  x[t + dilation]  ->  rows [2C, 3C) ------------------
        if s < tT:
            if T % tT != 0:
                # Ragged last tile only: columns whose +dilation source index
                # crosses T must be zeroed (Conv1d right padding).  Gate the
                # per-column mask so interior tiles skip it entirely.
                ragged = t0 + tT > T

                @pl.when(ragged)
                def _():
                    ii = jax.lax.broadcasted_iota(jnp.int32, (1, tT - s), 1)
                    taps_ref[2 * C:3 * C, 0:tT - s] = jnp.where(
                        t0 + s + ii < T, xc[:, s:], 0.0).astype(cd)

                @pl.when(jnp.logical_not(ragged))
                def _():
                    taps_ref[2 * C:3 * C, 0:tT - s] = xc[:, s:].astype(cd)
            else:
                taps_ref[2 * C:3 * C, 0:tT - s] = xc[:, s:].astype(cd)

        # Halo-sourced last s columns: masked only on the final tile(s) where
        # the +dilation target can cross T (also neutralizes the clamped
        # right-halo garbage on the last tile).
        need_mask = t0 + tT + s > T

        @pl.when(need_mask)
        def _():
            cc = jax.lax.broadcasted_iota(jnp.int32, (1, s), 1)
            taps_ref[2 * C:3 * C, tT - s:tT] = jnp.where(
                t0 + tT + cc < T, rh_ref[0, :, 0:s], 0.0).astype(cd)

        @pl.when(jnp.logical_not(need_mask))
        def _():
            taps_ref[2 * C:3 * C, tT - s:tT] = rh_ref[0, :, 0:s].astype(cd)

        # Fused 3-tap dilated conv: one MXU contraction with K = 3C.
        # TODO(synk): on v7x the MRB makes three K=C accumulating dots (no tap
        # scratch) roughly equivalent; the fused form is kept for v5e/v6e MRF.
        h = jnp.dot(wd_ref[...], taps_ref[...],
                    preferred_element_type=jnp.float32)       # (C, tT) f32
    else:
        # dilation >= T: the +/- dilation taps fall entirely inside Conv1d's
        # zero padding, so only the center tap contributes.  (The tiny unused
        # halo DMAs in this corner case are accepted for code simplicity.)
        h = jnp.dot(wd_ref[...], xc.astype(cd),
                    preferred_element_type=jnp.float32)

    h = jnp.maximum(h + bd_ref[...], 0.0)                     # bias + ReLU (f32)
    out = jnp.dot(w1_ref[...], h.astype(cd),
                  preferred_element_type=jnp.float32)
    # TODO(synk): nn.Dropout() is identity at inference; training-mode random
    # dropout is not implemented here.
    out = out + b1_ref[...] + xc                              # bias + residual
    out = out * mask_ref[0]                                   # (1, tT) bcast
    o_ref[0] = out.astype(o_ref.dtype)


def dilated_residual_layer(x, mask, params, dilation, *,
                           compute_dtype=jnp.float32, time_tile=None):
    """x, mask: (N, C, T) float32 (NCT, like nn.Conv1d).  Returns (N, C, T).

    `compute_dtype` controls the MXU operand dtype only (accumulation is f32).
    It defaults to float32 for bit-closeness to the PyTorch module; pass
    jnp.bfloat16 explicitly to trade a little accuracy for MXU throughput.
    """
    N, C, T = x.shape
    if dilation < 1:
        raise ValueError("dilation must be >= 1")
    w_dil, b_dil, w_1x1, b_1x1 = params            # (C,C,3), (C,), (C,C,1), (C,)

    # ---- VMEM-capacity-aware tile geometry ----------------------------------
    try:
        vmem_cap = int(pltpu.get_tpu_info().vmem_capacity_bytes)
    except Exception:
        vmem_cap = 64 * 1024 * 1024                # conservative (v7x per-TC)
    vmem_limit = min(int(vmem_cap * 0.6), 64 * 1024 * 1024)
    budget = min(int(vmem_cap * 0.4), 28 * 1024 * 1024)
    cd_size = jnp.dtype(compute_dtype).itemsize

    H = _round_up(dilation, LANE)                  # halo granule, lane aligned
    if T <= H:
        H = tT = T                                 # single full-length tile
        sides_active = dilation < T
    else:
        sides_active = True                        # dilation <= H < T
        if time_tile is not None:
            tT = int(time_tile)
            if tT < H or tT % H != 0:
                raise ValueError(
                    f"time_tile must be a positive multiple of the halo "
                    f"granule H={H}")
        else:
            # Real per-column working set: double-buffered center x + output,
            # the mask stream, the (3C,tT) tap scratch and f32 h/out temps,
            # plus the fixed halo / parameter cost.  Bigger tiles amortize the
            # ~0.35 us/step overhead and reach the HBM roofline on v5e/v6e.
            per_col = C * (8 + 8 + 12 + 3 * cd_size) + 8
            fixed = 16 * C * H + 8 * C * C * cd_size + 64 * C
            cols = max(H, max(budget - fixed, per_col * H) // per_col)
            max_tiles = pl.cdiv(T, H)              # one tile can cover all of T
            tT = min(max_tiles, max(1, cols // H)) * H

    m = tT // H
    nT = pl.cdiv(T, tT)
    nH = pl.cdiv(T, H)

    # ---- parameters: taps stacked along K, MXU operands pre-cast ------------
    if sides_active:
        wd = jnp.concatenate([w_dil[:, :, 0], w_dil[:, :, 1], w_dil[:, :, 2]],
                             axis=1).astype(compute_dtype)    # (C, 3C)
    else:
        wd = w_dil[:, :, 1].astype(compute_dtype)             # (C, C), center
    w1 = w_1x1[:, :, 0].astype(compute_dtype)                 # (C, C)
    bd = b_dil.reshape(C, 1).astype(jnp.float32)
    b1 = b_1x1.reshape(C, 1).astype(jnp.float32)
    mask_col = mask[:, 0:1, :]                                # (N, 1, T)

    kernel = functools.partial(
        _dilated_residual_kernel, T=T, dilation=dilation, tT=tT, H=H,
        sides_active=sides_active, compute_dtype=compute_dtype)

    scratch_shapes = ([pltpu.VMEM((3 * C, tT), compute_dtype)]
                      if sides_active else [])

    out = pl.pallas_call(
        kernel,
        out_shape=jax.ShapeDtypeStruct((N, C, T), x.dtype),
        grid=(N, nT),
        in_specs=[
            # left halo (clamped at the left edge; gated to zero at j == 0)
            pl.BlockSpec((1, C, H),
                         lambda b, j: (b, 0, jnp.maximum(j * m - 1, 0))),
            # current tile (center tap + residual)
            pl.BlockSpec((1, C, tT), lambda b, j: (b, 0, j)),
            # right halo (clamped at the right edge; masked in-kernel)
            pl.BlockSpec((1, C, H),
                         lambda b, j: (b, 0, jnp.minimum((j + 1) * m, nH - 1))),
            # mask, channel 0 only
            pl.BlockSpec((1, 1, tT), lambda b, j: (b, 0, j)),
            # parameters: constant block index -> fetched once, not per step
            pl.BlockSpec(wd.shape, lambda b, j: (0, 0)),
            pl.BlockSpec((C, 1), lambda b, j: (0, 0)),
            pl.BlockSpec((C, C), lambda b, j: (0, 0)),
            pl.BlockSpec((C, 1), lambda b, j: (0, 0)),
        ],
        out_specs=pl.BlockSpec((1, C, tT), lambda b, j: (b, 0, j)),
        scratch_shapes=scratch_shapes,
        compiler_params=pltpu.CompilerParams(
            dimension_semantics=("parallel", "parallel"),
            vmem_limit_bytes=vmem_limit),
    )(x, x, x, mask_col, wd, bd, w1, b1)

    return out


def reference(x, mask, params, dilation):
    """Pure-JAX reference of the PyTorch forward (eval mode), NCT layout."""
    w_dil, b_dil, w_1x1, b_1x1 = params
    N, C, T = x.shape
    xp = jnp.pad(x, ((0, 0), (0, 0), (dilation, dilation)))
    h = jnp.zeros((N, C, T), jnp.float32)
    for k in range(3):
        tap = xp[:, :, k * dilation:k * dilation + T]
        h = h + jnp.einsum('oi,nit->not', w_dil[:, :, k], tap)
    h = jax.nn.relu(h + b_dil[None, :, None])
    out = jnp.einsum('oi,nit->not', w_1x1[:, :, 0], h) + b_1x1[None, :, None]
    out = out + x
    out = out * mask[:, 0:1, :]
    return out


if __name__ == "__main__":
    def make_inputs(key, N, C, T):
        k1, k2, k3, k4, k5, k6 = jax.random.split(key, 6)
        w_dil = jax.random.normal(k1, (C, C, 3), jnp.float32) * 0.1
        b_dil = jax.random.normal(k2, (C,), jnp.float32) * 0.1
        w_1x1 = jax.random.normal(k3, (C, C, 1), jnp.float32) * 0.1
        b_1x1 = jax.random.normal(k4, (C,), jnp.float32) * 0.1
        x = jax.random.normal(k5, (N, C, T), jnp.float32)
        mask = (jax.random.uniform(k6, (N, C, T)) > 0.2).astype(jnp.float32)
        return x, mask, (w_dil, b_dil, w_1x1, b_1x1)

    configs = [
        # (name,               N, C,   T, dil, compute_dtype, time_tile, tol)
        ("multi-tile f32",     2, 8, 300,   4, jnp.float32,   128, 1e-4),
        ("multi-tile bf16",    2, 8, 300,   4, jnp.bfloat16,  128, 3e-2),
        ("dilation == tile",   2, 8, 300, 128, jnp.float32,   128, 1e-4),
        ("auto tile",          2, 8, 300,   4, jnp.float32,  None, 1e-4),
        ("tiny single tile",   2, 4,  16,   2, jnp.float32,  None, 1e-4),
        ("tiny, dil >= T",     2, 4,  16,  32, jnp.float32,  None, 1e-4),
    ]

    keys = jax.random.split(jax.random.PRNGKey(0), len(configs))
    for (name, N, C, T, dil, cd, tt, tol), k in zip(configs, keys):
        x, msk, p = make_inputs(k, N, C, T)
        out = jax.block_until_ready(
            dilated_residual_layer(x, msk, p, dil,
                                   compute_dtype=cd, time_tile=tt))
        ref = reference(x, msk, p, dil)
        assert out.shape == x.shape, f"{name}: bad shape"
        assert jnp.allclose(out, ref, atol=tol, rtol=tol), f"{name}: mismatch"

    print("KERNEL_OK")
</pallas_src>

<mosaic_0001>
module attributes {stable_mosaic.version = 11 : i64} {
  func.func @_dilated_residual_kernel(%arg0: i32, %arg1: i32, %arg2: memref<1x8x128xf32, #tpu.memory_space<vmem>>, %arg3: memref<1x8x128xf32, #tpu.memory_space<vmem>>, %arg4: memref<1x8x128xf32, #tpu.memory_space<vmem>>, %arg5: memref<1x1x128xf32, #tpu.memory_space<vmem>>, %arg6: memref<8x24xf32, #tpu.memory_space<vmem>>, %arg7: memref<8x1xf32, #tpu.memory_space<vmem>>, %arg8: memref<8x8xf32, #tpu.memory_space<vmem>>, %arg9: memref<8x1xf32, #tpu.memory_space<vmem>>, %arg10: memref<1x8x128xf32, #tpu.memory_space<vmem>>, %arg11: memref<24x128xf32, #tpu.memory_space<vmem>>) attributes {dimension_semantics = [#tpu.dimension_semantics<parallel>, #tpu.dimension_semantics<parallel>], iteration_bounds = array<i64: 2, 3>, scalar_prefetch = 0 : i64, scratch_operands = 1 : i64, tpu.core_type = #tpu.core_type<tc>, window_params = [{transform_indices = @transform_0, window_bounds = array<i64: 1, 8, 128>}, {transform_indices = @transform_1, window_bounds = array<i64: 1, 8, 128>}, {transform_indices = @transform_2, window_bounds = array<i64: 1, 8, 128>}, {transform_indices = @transform_3, window_bounds = array<i64: 1, 1, 128>}, {pipeline_mode = #tpu.pipeline_mode<synchronous>, transform_indices = @transform_4, window_bounds = array<i64: 8, 24>}, {pipeline_mode = #tpu.pipeline_mode<synchronous>, transform_indices = @transform_5, window_bounds = array<i64: 8, 1>}, {pipeline_mode = #tpu.pipeline_mode<synchronous>, transform_indices = @transform_6, window_bounds = array<i64: 8, 8>}, {pipeline_mode = #tpu.pipeline_mode<synchronous>, transform_indices = @transform_7, window_bounds = array<i64: 8, 1>}, {transform_indices = @transform_8, window_bounds = array<i64: 1, 8, 128>}]} {
    %c128_i32 = arith.constant 128 : i32
    %0 = arith.muli %arg1, %c128_i32 : i32
    %c0 = arith.constant 0 : index
    %c0_0 = arith.constant 0 : index
    %c0_1 = arith.constant 0 : index
    %1 = vector.load %arg3[%c0, %c0_0, %c0_1] : memref<1x8x128xf32, #tpu.memory_space<vmem>>, vector<1x8x128xf32>
    %2 = vector.shape_cast %1 : vector<1x8x128xf32> to vector<8x128xf32>
    %c0_i32 = arith.constant 0 : i32
    %3 = arith.cmpi eq, %arg1, %c0_i32 : i32
    %4 = arith.extui %3 : i1 to i32
    %c0_i32_2 = arith.constant 0 : i32
    %5 = arith.cmpi ne, %4, %c0_i32_2 : i32
    scf.if %5 {
      %cst_33 = arith.constant 0.000000e+00 : f32
      %48 = vector.broadcast %cst_33 : f32 to vector<8x4xf32>
      %c0_34 = arith.constant 0 : index
      %c0_35 = arith.constant 0 : index
      %49 = vector.load %arg11[%c0_34, %c0_35] : memref<24x128xf32, #tpu.memory_space<vmem>>, vector<8x4xf32>
      tpu.vector_store %arg11[%c0_34, %c0_35], %48 {strides = array<i32>} : memref<24x128xf32, #tpu.memory_space<vmem>>, vector<8x4xf32>,
    } else {
    }
    %c0_i32_3 = arith.constant 0 : i32
    %6 = arith.cmpi sgt, %arg1, %c0_i32_3 : i32
    %7 = arith.extui %6 : i1 to i32
    %c0_i32_4 = arith.constant 0 : i32
    %8 = arith.cmpi ne, %7, %c0_i32_4 : i32
    scf.if %8 {
      %c0_33 = arith.constant 0 : index
      %c0_34 = arith.constant 0 : index
      %c124 = arith.constant 124 : index
      %48 = vector.load %arg2[%c0_33, %c0_34, %c124] : memref<1x8x128xf32, #tpu.memory_space<vmem>>, vector<1x8x4xf32>
      %49 = vector.shape_cast %48 : vector<1x8x4xf32> to vector<8x4xf32>
      %c0_35 = arith.constant 0 : index
      %c0_36 = arith.constant 0 : index
      %50 = vector.load %arg11[%c0_35, %c0_36] : memref<24x128xf32, #tpu.memory_space<vmem>>, vector<8x4xf32>
      tpu.vector_store %arg11[%c0_35, %c0_36], %49 {strides = array<i32>} : memref<24x128xf32, #tpu.memory_space<vmem>>, vector<8x4xf32>,
    } else {
    }
    %9 = vector.extract_strided_slice %2 {offsets = [0, 0], sizes = [8, 124], strides = [1, 1]} : vector<8x128xf32> to vector<8x124xf32>
    %c0_5 = arith.constant 0 : index
    %c4 = arith.constant 4 : index
    %10 = vector.load %arg11[%c0_5, %c4] : memref<24x128xf32, #tpu.memory_space<vmem>>, vector<8x124xf32>
    tpu.vector_store %arg11[%c0_5, %c4], %9 {strides = array<i32>} : memref<24x128xf32, #tpu.memory_space<vmem>>, vector<8x124xf32>,
    %c8 = arith.constant 8 : index
    %c0_6 = arith.constant 0 : index
    %11 = vector.load %arg11[%c8, %c0_6] : memref<24x128xf32, #tpu.memory_space<vmem>>, vector<8x128xf32>
    tpu.vector_store %arg11[%c8, %c0_6], %2 {strides = array<i32>} : memref<24x128xf32, #tpu.memory_space<vmem>>, vector<8x128xf32>,
    %c128_i32_7 = arith.constant 128 : i32
    %12 = arith.addi %0, %c128_i32_7 : i32
    %c300_i32 = arith.constant 300 : i32
    %13 = arith.cmpi sgt, %12, %c300_i32 : i32
    %14 = arith.extui %13 : i1 to i32
    %c0_i32_8 = arith.constant 0 : i32
    %15 = arith.cmpi ne, %14, %c0_i32_8 : i32
    scf.if %15 {
      %48 = tpu.iota {dimensions = array<i32: 1>} : vector<1x124xi32>
      %c4_i32_33 = arith.constant 4 : i32
      %49 = arith.addi %0, %c4_i32_33 : i32
      %50 = vector.broadcast %49 : i32 to vector<1x124xi32>
      %51 = arith.addi %50, %48 : vector<1x124xi32>
      %c300_i32_34 = arith.constant 300 : i32
      %52 = vector.broadcast %c300_i32_34 : i32 to vector<1x124xi32>
      %53 = arith.cmpi slt, %51, %52 : vector<1x124xi32>
      %54 = vector.extract_strided_slice %2 {offsets = [0, 4], sizes = [8, 124], strides = [1, 1]} : vector<8x128xf32> to vector<8x124xf32>
      %cst_35 = arith.constant 0.000000e+00 : f32
      %55 = vector.shape_cast %53 : vector<1x124xi1> to vector<1x124xi1>
      %56 = vector.broadcast %55 : vector<1x124xi1> to vector<8x124xi1>
      %57 = vector.broadcast %cst_35 : f32 to vector<8x124xf32>
      %58 = arith.select %56, %54, %57 : vector<8x124xi1>, vector<8x124xf32>
      %c16 = arith.constant 16 : index
      %c0_36 = arith.constant 0 : index
      %59 = vector.load %arg11[%c16, %c0_36] : memref<24x128xf32, #tpu.memory_space<vmem>>, vector<8x124xf32>
      tpu.vector_store %arg11[%c16, %c0_36], %58 {strides = array<i32>} : memref<24x128xf32, #tpu.memory_space<vmem>>, vector<8x124xf32>,
    } else {
    }
    %true = arith.constant true
    %16 = arith.xori %13, %true : i1
    %17 = arith.extui %16 : i1 to i32
    %c0_i32_9 = arith.constant 0 : i32
    %18 = arith.cmpi ne, %17, %c0_i32_9 : i32
    scf.if %18 {
      %48 = vector.extract_strided_slice %2 {offsets = [0, 4], sizes = [8, 124], strides = [1, 1]} : vector<8x128xf32> to vector<8x124xf32>
      %c16 = arith.constant 16 : index
      %c0_33 = arith.constant 0 : index
      %49 = vector.load %arg11[%c16, %c0_33] : memref<24x128xf32, #tpu.memory_space<vmem>>, vector<8x124xf32>
      tpu.vector_store %arg11[%c16, %c0_33], %48 {strides = array<i32>} : memref<24x128xf32, #tpu.memory_space<vmem>>, vector<8x124xf32>,
    } else {
    }
    %c128_i32_10 = arith.constant 128 : i32
    %19 = arith.addi %0, %c128_i32_10 : i32
    %c4_i32 = arith.constant 4 : i32
    %20 = arith.addi %19, %c4_i32 : i32
    %c300_i32_11 = arith.constant 300 : i32
    %21 = arith.cmpi sgt, %20, %c300_i32_11 : i32
    %22 = arith.extui %21 : i1 to i32
    %c0_i32_12 = arith.constant 0 : i32
    %23 = arith.cmpi ne, %22, %c0_i32_12 : i32
    scf.if %23 {
      %48 = tpu.iota {dimensions = array<i32: 1>} : vector<1x4xi32>
      %c128_i32_33 = arith.constant 128 : i32
      %49 = arith.addi %0, %c128_i32_33 : i32
      %50 = vector.broadcast %49 : i32 to vector<1x4xi32>
      %51 = arith.addi %50, %48 : vector<1x4xi32>
      %c300_i32_34 = arith.constant 300 : i32
      %52 = vector.broadcast %c300_i32_34 : i32 to vector<1x4xi32>
      %53 = arith.cmpi slt, %51, %52 : vector<1x4xi32>
      %c0_35 = arith.constant 0 : index
      %c0_36 = arith.constant 0 : index
      %c0_37 = arith.constant 0 : index
      %54 = vector.load %arg4[%c0_35, %c0_36, %c0_37] : memref<1x8x128xf32, #tpu.memory_space<vmem>>, vector<1x8x4xf32>
      %55 = vector.shape_cast %54 : vector<1x8x4xf32> to vector<8x4xf32>
      %cst_38 = arith.constant 0.000000e+00 : f32
      %56 = vector.shape_cast %53 : vector<1x4xi1> to vector<1x4xi1>
      %57 = vector.broadcast %56 : vector<1x4xi1> to vector<8x4xi1>
      %58 = vector.broadcast %cst_38 : f32 to vector<8x4xf32>
      %59 = arith.select %57, %55, %58 : vector<8x4xi1>, vector<8x4xf32>
      %c16 = arith.constant 16 : index
      %c124 = arith.constant 124 : index
      %60 = vector.load %arg11[%c16, %c124] : memref<24x128xf32, #tpu.memory_space<vmem>>, vector<8x4xf32>
      tpu.vector_store %arg11[%c16, %c124], %59 {strides = array<i32>} : memref<24x128xf32, #tpu.memory_space<vmem>>, vector<8x4xf32>,
    } else {
    }
    %true_13 = arith.constant true
    %24 = arith.xori %21, %true_13 : i1
    %25 = arith.extui %24 : i1 to i32
    %c0_i32_14 = arith.constant 0 : i32
    %26 = arith.cmpi ne, %25, %c0_i32_14 : i32
    scf.if %26 {
      %c0_33 = arith.constant 0 : index
      %c0_34 = arith.constant 0 : index
      %c0_35 = arith.constant 0 : index
      %48 = vector.load %arg4[%c0_33, %c0_34, %c0_35] : memref<1x8x128xf32, #tpu.memory_space<vmem>>, vector<1x8x4xf32>
      %49 = vector.shape_cast %48 : vector<1x8x4xf32> to vector<8x4xf32>
      %c16 = arith.constant 16 : index
      %c124 = arith.constant 124 : index
      %50 = vector.load %arg11[%c16, %c124] : memref<24x128xf32, #tpu.memory_space<vmem>>, vector<8x4xf32>
      tpu.vector_store %arg11[%c16, %c124], %49 {strides = array<i32>} : memref<24x128xf32, #tpu.memory_space<vmem>>, vector<8x4xf32>,
    } else {
    }
    %c0_15 = arith.constant 0 : index
    %c0_16 = arith.constant 0 : index
    %27 = vector.load %arg6[%c0_15, %c0_16] : memref<8x24xf32, #tpu.memory_space<vmem>>, vector<8x24xf32>
    %c0_17 = arith.constant 0 : index
    %c0_18 = arith.constant 0 : index
    %28 = vector.load %arg11[%c0_17, %c0_18] : memref<24x128xf32, #tpu.memory_space<vmem>>, vector<24x128xf32>
    %cst = arith.constant dense<0.000000e+00> : vector<8x128xf32>
    %29 = tpu.matmul %27, %28, %cst {dimension_numbers = #tpu.dot_dimension_numbers<[1], [0], [0], [1], [0, 0, 1, 1], [], []>} : vector<8x24xf32>, vector<24x128xf32>, vector<8x128xf32> -> vector<8x128xf32>
    %c0_19 = arith.constant 0 : index
    %c0_20 = arith.constant 0 : index
    %30 = vector.load %arg7[%c0_19, %c0_20] : memref<8x1xf32, #tpu.memory_space<vmem>>, vector<8x1xf32>
    %31 = vector.broadcast %30 : vector<8x1xf32> to vector<8x128xf32>
    %32 = arith.addf %29, %31 : vector<8x128xf32>
    %cst_21 = arith.constant 0.000000e+00 : f32
    %33 = vector.broadcast %cst_21 : f32 to vector<8x128xf32>
    %34 = arith.maximumf %32, %33 : vector<8x128xf32>
    %c0_22 = arith.constant 0 : index
    %c0_23 = arith.constant 0 : index
    %35 = vector.load %arg8[%c0_22, %c0_23] : memref<8x8xf32, #tpu.memory_space<vmem>>, vector<8x8xf32>
    %cst_24 = arith.constant dense<0.000000e+00> : vector<8x128xf32>
    %36 = tpu.matmul %35, %34, %cst_24 {dimension_numbers = #tpu.dot_dimension_numbers<[1], [0], [0], [1], [0, 0, 1, 1], [], []>} : vector<8x8xf32>, vector<8x128xf32>, vector<8x128xf32> -> vector<8x128xf32>
    %c0_25 = arith.constant 0 : index
    %c0_26 = arith.constant 0 : index
    %37 = vector.load %arg9[%c0_25, %c0_26] : memref<8x1xf32, #tpu.memory_space<vmem>>, vector<8x1xf32>
    %38 = vector.broadcast %37 : vector<8x1xf32> to vector<8x128xf32>
    %39 = arith.addf %36, %38 : vector<8x128xf32>
    %40 = arith.addf %39, %2 : vector<8x128xf32>
    %c0_27 = arith.constant 0 : index
    %c0_28 = arith.constant 0 : index
    %c0_29 = arith.constant 0 : index
    %41 = vector.load %arg5[%c0_27, %c0_28, %c0_29] : memref<1x1x128xf32, #tpu.memory_space<vmem>>, vector<1x1x128xf32>
    %42 = vector.shape_cast %41 : vector<1x1x128xf32> to vector<1x128xf32>
    %43 = vector.broadcast %42 : vector<1x128xf32> to vector<8x128xf32>
    %44 = arith.mulf %40, %43 : vector<8x128xf32>
    %c0_30 = arith.constant 0 : index
    %c0_31 = arith.constant 0 : index
    %c0_32 = arith.constant 0 : index
    %45 = vector.load %arg10[%c0_30, %c0_31, %c0_32] : memref<1x8x128xf32, #tpu.memory_space<vmem>>, vector<1x8x128xf32>
    %46 = vector.shape_cast %45 : vector<1x8x128xf32> to vector<8x128xf32>
    %47 = vector.shape_cast %44 : vector<8x128xf32> to vector<1x8x128xf32>
    tpu.vector_store %arg10[%c0_30, %c0_31, %c0_32], %47 {strides = array<i32>} : memref<1x8x128xf32, #tpu.memory_space<vmem>>, vector<1x8x128xf32>,
    return
  }
  func.func @transform_0(%arg0: i32, %arg1: i32) -> (i32, i32, i32) {
    %c1_i32 = arith.constant 1 : i32
    %0 = arith.muli %arg1, %c1_i32 : i32
    %c1_i32_0 = arith.constant 1 : i32
    %1 = arith.subi %0, %c1_i32_0 : i32
    %c0_i32 = arith.constant 0 : i32
    %2 = arith.maxsi %1, %c0_i32 : i32
    %c0_i32_1 = arith.constant 0 : i32
    %c0_i32_2 = arith.constant 0 : i32
    return %arg0, %c0_i32_1, %2 : i32, i32, i32
  }
  func.func @transform_1(%arg0: i32, %arg1: i32) -> (i32, i32, i32) {
    %c0_i32 = arith.constant 0 : i32
    %c0_i32_0 = arith.constant 0 : i32
    return %arg0, %c0_i32, %arg1 : i32, i32, i32
  }
  func.func @transform_2(%arg0: i32, %arg1: i32) -> (i32, i32, i32) {
    %c1_i32 = arith.constant 1 : i32
    %0 = arith.addi %arg1, %c1_i32 : i32
    %c1_i32_0 = arith.constant 1 : i32
    %1 = arith.muli %0, %c1_i32_0 : i32
    %c2_i32 = arith.constant 2 : i32
    %2 = arith.minsi %1, %c2_i32 : i32
    %c0_i32 = arith.constant 0 : i32
    %c0_i32_1 = arith.constant 0 : i32
    return %arg0, %c0_i32, %2 : i32, i32, i32
  }
  func.func @transform_3(%arg0: i32, %arg1: i32) -> (i32, i32, i32) {
    %c0_i32 = arith.constant 0 : i32
    %c0_i32_0 = arith.constant 0 : i32
    return %arg0, %c0_i32, %arg1 : i32, i32, i32
  }
  func.func @transform_4(%arg0: i32, %arg1: i32) -> (i32, i32) {
    %c0_i32 = arith.constant 0 : i32
    %c0_i32_0 = arith.constant 0 : i32
    %c0_i32_1 = arith.constant 0 : i32
    return %c0_i32, %c0_i32_0 : i32, i32
  }
  func.func @transform_5(%arg0: i32, %arg1: i32) -> (i32, i32) {
    %c0_i32 = arith.constant 0 : i32
    %c0_i32_0 = arith.constant 0 : i32
    %c0_i32_1 = arith.constant 0 : i32
    return %c0_i32, %c0_i32_0 : i32, i32
  }
  func.func @transform_6(%arg0: i32, %arg1: i32) -> (i32, i32) {
    %c0_i32 = arith.constant 0 : i32
    %c0_i32_0 = arith.constant 0 : i32
    %c0_i32_1 = arith.constant 0 : i32
    return %c0_i32, %c0_i32_0 : i32, i32
  }
  func.func @transform_7(%arg0: i32, %arg1: i32) -> (i32, i32) {
    %c0_i32 = arith.constant 0 : i32
    %c0_i32_0 = arith.constant 0 : i32
    %c0_i32_1 = arith.constant 0 : i32
    return %c0_i32, %c0_i32_0 : i32, i32
  }
  func.func @transform_8(%arg0: i32, %arg1: i32) -> (i32, i32, i32) {
    %c0_i32 = arith.constant 0 : i32
    %c0_i32_0 = arith.constant 0 : i32
    return %arg0, %c0_i32, %arg1 : i32, i32, i32
  }
}

</mosaic_0001>

<bundles_post_ra>
// kernel: tpu_custom_call.1
= control target key start
LH: loop header
LB: loop body
LE: loop exit
PB: predicated region body
PF: predicated region fallthrough
CT: control target
= control target key end

     0   :  { %s1900_s0 = inlined_call_operand.hbm [shape: f32[2,8,300], index: 0, kind: input, shape index: {}]   ;;  %s1901_s1 = inlined_call_operand.hbm [shape: f32[2,8,300], index: 1, kind: input, shape index: {}]   ;;  %s1902_s2 = inlined_call_operand.hbm [shape: f32[2,8,300], index: 2, kind: input, shape index: {}]   ;;  %s1903_s3 = inlined_call_operand.vmem [shape: f32[2,1,300], index: 3, kind: input, shape index: {}]   ;;  %s1904_s4 = inlined_call_operand.vmem [shape: f32[8,24], index: 4, kind: input, shape index: {}]   ;;  %s1905_s5 = inlined_call_operand.vmem [shape: f32[8,1], index: 5, kind: input, shape index: {}]   ;;  %s1906_s6 = inlined_call_operand.vmem [shape: f32[8,8], index: 6, kind: input, shape index: {}]   ;;  %s1907_s7 = inlined_call_operand.vmem [shape: f32[8,1], index: 7, kind: input, shape index: {}]   ;;  %s1908_s8 = inlined_call_operand.hbm [shape: f32[2,8,300], index: 8, kind: output, shape index: {}]  }
   0x1   :  { %1934 = sst [smem:[#allocation26_spill]] %s1901_s1 }
   0x2   :  { %1935 = sst [smem:[#allocation27_spill]] %s1902_s2 }
   0x3   :  { %1936 = sst [smem:[#allocation28_spill]] %s1903_s3 }
   0x4   :  { %1937 = sst [smem:[#allocation29_spill]] %s1904_s4 }
   0x5   :  { %1938 = sst [smem:[#allocation30_spill]] %s1905_s5 }
   0x6   :  { %1939 = sst [smem:[#allocation31_spill]] %s1906_s6 }
   0x7   :  { %1940 = sst [smem:[#allocation32_spill]] %s1907_s7 }
   0x8   :  { %1941 = sst [smem:[#allocation33_spill]] %s1908_s8 }
   0x9   :  { %13 = vsyncpa [#allocation4], 0 }
   0xa   :  { %15 = vsyncpa [#allocation4 + $0x1], 0 }
   0xb   :  { %16 = vsyncpa [#allocation7], 0 }
   0xc   :  { %18 = vsyncpa [#allocation7 + $0x1], 0 }
   0xd   :  { %19 = vsyncpa [#allocation5], 0 }
   0xe   :  { %21 = vsyncpa [#allocation5 + $0x1], 0  ;;  %s1408_s27 = smov 0   ;;  %s1410_s28 = smov 0  }
   0xf   :  { %s1412_s29 = smov 0   ;;  %s1414_s30 = smov 0  }
  0x10   :  { %s1416_s9 = smov 0   ;;  %s1418_s10 = smov 0  }
  0x11   :  { %s1420_s11 = smov 0   ;;  %s1422_s12 = smov 0  }
  0x12   :  { %s1424_s13 = smov 0   ;;  %s1426_s14 = smov 0  }
  0x13   :  { %s1428_s15 = smov 0   ;;  %s1430_s16 = smov 0  }
  0x14   :  { %s1432_s17 = smov 0   ;;  %s1434_s18 = smov 0  }
  0x15 LB: > { %1942 = sst [smem:[#allocation14_spill]] %s1306_s30  ;;  %s1479_s19 = sadd.s32 4294967295, %s1346_s18   ;;  %s1346_s18 = sphi %s1434_s18, %s27_s18   ;;  %s1342_s17 = sphi %s1432_s17, %s2009_s17   ;;  %s1338_s16 = sphi %s1430_s16, %s2020_s16   ;;  %s1334_s15 = sphi %s1428_s15, %s2019_s15   ;;  %s1330_s14 = sphi %s1426_s14, %s2018_s14   ;;  %s1326_s13 = sphi %s1424_s13, %s2017_s13   ;;  %s1322_s12 = sphi %s1422_s12, %s2016_s12   ;;  %s1318_s11 = sphi %s1420_s11, %s2007_s11   ;;  %s1314_s10 = sphi %s1418_s10, %s2015_s10   ;;  %s1310_s9 = sphi %s1416_s9, %s2014_s9   ;;  %s1306_s30 = sphi %s1414_s30, %s2006_s30   ;;  %s1302_s29 = sphi %s1412_s29, %s2013_s29   ;;  %s1298_s28 = sphi %s1410_s28, %s2012_s28   ;;  %s1294_s27 = sphi %s1408_s27, %s2011_s27  }
  0x16   : > { %1943 = sst [smem:[#allocation15_spill]] %s1310_s9  ;;  %s895_s20 = sadd.s32 4294967294, %s1346_s18  }
  0x17   : > { %1944 = sst [smem:[#allocation16_spill]] %s1322_s12  ;;  %s1483_s21 = sadd.s32 1, %s1338_s16 }
  0x18   : > { %1945 = sst [smem:[#allocation17_spill]] %s1330_s14  ;;  %p1920_p0 = scmp.ge.s32.totalorder %s1483_s21, 3 }
  0x19   : > { %1946 = sst [smem:[#allocation18_spill]] %s1334_s15  ;;  %p1919_p1 = scmp.eq.s32.totalorder %s1346_s18, 0 }
  0x1a   : > { %1947 = sst [smem:[#allocation19_spill]] %s1342_s17  ;;  %p1917_p2 = scmp.eq.s32.totalorder %s1479_s19, 0 }
  0x1b   : > { %s1493_s24 = scalar_select %p1920_p0, 0, %s1483_s21  }
  0x1c   : > { %p89_p3 = scmp.ne.s32.totalorder %s1314_s10, %s1310_s9  ;;  %p95_p4 = scmp.ne.s32.totalorder %s1310_s9, %s1306_s30 }
  0x1d   : > { %p267_p5 = scmp.eq.s32.totalorder %s1479_s19, 5  ;;  %p273_p9 = scmp.eq.s32.totalorder %s895_s20, 5 }
  0x1e   : > { %p1504_p6 = por %p89_p3, %p1919_p1  ;;  %p1510_p7 = por %p95_p4, %p1917_p2 }
  0x1f   : > { %p1514_p8 = por %p267_p5, %p89_p3  ;;  %p1918_p10 = scmp.lt.s32.totalorder %s1346_s18, 6 }
  0x20   : > { %s1949_s22 = scalar_select %p1510_p7, 1, 0 }
  0x21   : > { %s1951_s23 = scalar_select %p1514_p8, 1, 0 }
  0x22   : > { %1950 = sst [smem:[#allocation20_spill]] %s1949_s22  ;;  %p1519_p11 = por %p273_p9, %p95_p4 }
  0x23   : > { %1952 = sst [smem:[#allocation21_spill]] %s1951_s23  ;;  %s1524_s30 = smul.u32 3, %s1342_s17 }
  0x24   : > { %s1953_s25 = scalar_select %p1519_p11, 1, 0 }
  0x25   : > { %s328_s8 = sand.u32 1, %s1346_s18   ;;  %s330_s6 = sand.u32 1, %s1314_s10  }
  0x26   : > { %1954 = sst [smem:[#allocation22_spill]] %s1953_s25  ;;  %s903_s4 = sshll.u32 %s330_s6, 3 }
  0x27   : > { %s337_s7 = sadd.s32 %s1338_s16, %s1524_s30  ;;  %s332_s3 = scalar_lea.vmem [#allocation6], %s903_s4 }
  0x28   : > { %s904_s5 = sshll.u32 %s337_s7, 7  ;;  %s341_s14 = sshll.u32 %s332_s3, 4  ;;  %s1535_s14 = int_to_ptr.vmem [resolvable:$true] %s341_s14 }
  0x29   : > { %s1955_s1 = sld [smem:[#allocation26_spill]]  ;;  %p1541_p12 = pnand %p1918_p10, %p1504_p6 }
  0x2a   : > { %s1547_s3 = scalar_lea.sflag [#allocation7], %s328_s8 }
  0x2b   : > { %1957 = sst [smem:[#allocation23_spill]] %s1547_s3  ;;  %p1104_p5 = pneg %p1541_p12 }
  0x2f   : > { %s1533_s23 = scalar_lea.hbm %s1955_s1, %s904_s5  ;;  %s1107_s7 = scalar_lea.hbm %s1955_s1, 768 }
  0x30   : > { %s1102_s4 = scalar_lea.hbm %s1533_s23, 128  ;;  %p1108_p6 = scmp.lt.u32.totalorder %s1533_s23, %s1955_s1 }
  0x31   : > { %p1103_p4 = scmp.ne.s32.totalorder %s1533_s23, %s1102_s4  ;;  %p1109_p10 = scmp.lt.u32.totalorder %s1107_s7, %s1102_s4 }
  0x32   : > { %p1111_p0 = scmp.lt.u32.totalorder %s1102_s4, %s1533_s23 }
  0x33   : > { %p1105_p9 = pnand %p1104_p5, %p1103_p4  ;;  %p1110_p1 = por %p1109_p10, %p1108_p6 }
  0x35   : > { %p1106_p2 = pneg %p1105_p9  ;;  %p1112_p13 = por %p1111_p0, %p1110_p1 }
  0x37   : > { %p1113_p3 = pnand %p1112_p13, %p1106_p2 }
  0x39   : > { %1116 = shalt.err (!%p1113_p3)
}
  0x3a   : > { %s1117_s8 = scalar_lea.vmem %s1535_s14, 128  ;;  %s1348_s26 = smov [#allocation6]  }
  0x3b   : > { %p1118_p4 = scmp.ne.s32.totalorder %s1535_s14, %s1117_s8  ;;  %s1122_s5 = sshll.u32 %s1348_s26, 4  ;;  %s1123_s5 = int_to_ptr.vmem [resolvable:$false] %s1122_s5 }
  0x3c   : > { %s1124_s6 = scalar_lea.vmem %s1123_s5, 256  ;;  %p1125_p8 = scmp.lt.s32.totalorder %s1535_s14, %s1123_s5 }
  0x3d   : > { %p1120_p9 = pnand %p1118_p4, %p1104_p5  ;;  %p1126_p10 = scmp.lt.s32.totalorder %s1124_s6, %s1117_s8 }
  0x3f   : > { %p1121_p11 = pneg %p1120_p9  ;;  %p1127_p6 = por %p1126_p10, %p1125_p8 }
  0x41   : > { %p1128_p0 = pnand %p1127_p6, %p1121_p11 }
  0x43   : > { %1131 = shalt.err (!%p1128_p0)
}
  0x44   : > { %968 = dma.hbm_to_vmem [thread:$0]  (!%p1541_p12), %s1533_s23, 128, %s1535_s14, %s1547_s3  }
  0x45   : > { %p1958_p1 = scmp.lt.s32.totalorder %s1346_s18, 7  ;;  %p1959_p2 = scmp.ge.s32.totalorder %s1346_s18, 1 }
  0x46   : > { %s896_s4 = sadd.s32 4294967295, %s1338_s16  ;;  %s1962_s7 = sadd.s32 1, %s1342_s17 }
  0x47   : > { %p1579_p8 = pnand %p1959_p2, %p1958_p1  ;;  %p1963_p11 = scmp.ge.s32.totalorder %s1483_s21, 3 }
  0x48   : > { %p44_p13 = scmp.gt.s32.totalorder %s896_s4, 0  ;;  %s897_s15 = sadd.s32 4294967295, %s1493_s24 }
  0x49   : > { %s1960_s20 = scalar_select %p1579_p8, 1, 0 }
  0x4a   : > { %s2022_s7 = smov (!%p1963_p11, %s1962_s7), %s1342_s17  ;;  %p47_p3 = scmp.gt.s32.totalorder %s897_s15, 0 }
  0x4b   : > { %1961 = sst [smem:[#allocation24_spill]] %s1960_s20  ;;  %p41_p12 = scmp.ge.s32.totalorder %s2022_s7, 2 }
  0x4c   : > { %s2024_s4 = smov (!%p44_p13, %s896_s4), 0  ;;  %s2028_s15 = smov (!%p47_p3, %s897_s15), 0 }
  0x4d   : > { %s2026_s7 = smov (%p41_p12, %s2022_s7), 0  ;;  %s54_s23 = sadd.s32 1, %s1326_s13 }
  0x4e   : > { %1964 = sst [smem:[#allocation25_spill]] %s2026_s7  ;;  %s1594_s14 = ssub.s32 %s1342_s17, %s2026_s7 }
  0x4f   : > { %s50_s22 = ssub.s32 %s2024_s4, %s2028_s15  ;;  %p61_p5 = scmp.ne.s32.totalorder %s1326_s13, %s1322_s12 }
  0x50   : > { %s51_s8 = sor.u32 %s50_s22, %s1594_s14  ;;  %p67_p4 = scmp.ne.s32.totalorder %s1322_s12, %s1318_s11 }
  0x51   : > { %p52_p9 = scmp.eq.s32.totalorder %s51_s8, 0  ;;  %p1965_p10 = scmp.eq.s32.totalorder %s1346_s18, 0 }
  0x52   : > { %p1967_p0 = scmp.eq.s32.totalorder %s1479_s19, 0  ;;  %s1969_s6 = ssub.s32 %s1338_s16, %s1493_s24 }
  0x53   : > { %p1604_p6 = por %p1965_p10, %p61_p5  ;;  %s79_s1 = sor.u32 %s1969_s6, %s1594_s14 }
  0x54   : > { %p1610_p1 = por %p1967_p0, %p67_p4  ;;  %p80_p2 = scmp.eq.s32.totalorder %s79_s1, 0 }
  0x55   : > { %s1619_s7 = scalar_select %p52_p9, %s1326_s13, %s54_s23  }
  0x56   : > { %s1968_s5 = scalar_select %p1610_p1, 1, 0 }
  0x57   : > { %s305_s15 = sand.u32 1, %s1326_s13   ;;  %s1970_s22 = sadd.s32 1, %s1314_s10 }
  0x58   : > { %s900_s11 = sshll.u32 %s305_s15, 3  ;;  %s317_s17 = sadd.s32 %s1524_s30, %s2024_s4 }
  0x59   : > { %s1625_s8 = scalar_select %p80_p2, %s1314_s10, %s1970_s22  }
  0x5a   : > { %s902_s25 = sshll.u32 %s317_s17, 7  ;;  %s309_s9 = scalar_lea.vmem [#allocation3], %s900_s11 }
  0x5b   : > { %s321_s12 = sshll.u32 %s309_s9, 4  ;;  %s1631_s2 = scalar_lea.hbm %s1900_s0, %s902_s25  ;;  %s1633_s12 = int_to_ptr.vmem [resolvable:$true] %s321_s12 }
  0x5c   : > { %p1971_p11 = scmp.lt.s32.totalorder %s1346_s18, 6  ;;  %s306_s9 = scalar_lea.sflag [#allocation4], %s305_s15 }
  0x5d   : > { %s1132_s17 = scalar_lea.hbm %s1631_s2, 128  ;;  %s1137_s20 = scalar_lea.hbm %s1900_s0, 768 }
  0x5e   : > { %p1639_p13 = pnand %p1971_p11, %p1604_p6  ;;  %p1133_p12 = scmp.ne.s32.totalorder %s1631_s2, %s1132_s17 }
  0x5f   : > { %p1138_p9 = scmp.lt.u32.totalorder %s1631_s2, %s1900_s0  ;;  %p1139_p10 = scmp.lt.u32.totalorder %s1137_s20, %s1132_s17 }
  0x60   : > { %p1134_p3 = pneg %p1639_p13  ;;  %p1141_p0 = scmp.lt.u32.totalorder %s1132_s17, %s1631_s2 }
  0x61   : > { %p1140_p6 = por %p1139_p10, %p1138_p9 }
  0x62   : > { %p1135_p5 = pnand %p1134_p3, %p1133_p12 }
  0x63   : > { %p1142_p2 = por %p1141_p0, %p1140_p6 }
  0x64   : > { %p1136_p4 = pneg %p1135_p5 }
  0x66   : > { %p1143_p11 = pnand %p1142_p2, %p1136_p4 }
  0x68   : > { %1146 = shalt.err (!%p1143_p11)
}
  0x69   : > { %s1147_s26 = scalar_lea.vmem %s1633_s12, 128  ;;  %s1349_s6 = smov [#allocation3]  }
  0x6a   : > { %p1148_p12 = scmp.ne.s32.totalorder %s1633_s12, %s1147_s26  ;;  %s1152_s15 = sshll.u32 %s1349_s6, 4  ;;  %s1153_s15 = int_to_ptr.vmem [resolvable:$false] %s1152_s15 }
  0x6b   : > { %s1154_s11 = scalar_lea.vmem %s1153_s15, 256  ;;  %p1155_p1 = scmp.lt.s32.totalorder %s1633_s12, %s1153_s15 }
  0x6c   : > { %p1150_p5 = pnand %p1148_p12, %p1134_p3  ;;  %p1156_p9 = scmp.lt.s32.totalorder %s1154_s11, %s1147_s26 }
  0x6e   : > { %p1151_p7 = pneg %p1150_p5  ;;  %p1157_p10 = por %p1156_p9, %p1155_p1 }
  0x70   : > { %p1158_p6 = pnand %p1157_p10, %p1151_p7 }
  0x72   : > { %1161 = shalt.err (!%p1158_p6)
}
  0x73   : > { %965 = dma.hbm_to_vmem [thread:$0]  (!%p1639_p13), %s1631_s2, 128, %s1633_s12, %s306_s9  }
  0x74   : > { %p106_p7 = scmp.lt.s32.totalorder %s1483_s21, 2  ;;  %s108_s22 = sadd.s32 1, %s1493_s24 }
  0x75   : > { %p109_p1 = scmp.lt.s32.totalorder %s108_s22, 2  ;;  %s116_s1 = sadd.s32 1, %s1302_s29 }
  0x76   : > { %s2030_s21 = smov (!%p106_p7, %s1483_s21), 2  ;;  %p123_p3 = scmp.ne.s32.totalorder %s1302_s29, %s1298_s28 }
  0x77   : > { %s2032_s22 = smov (!%p109_p1, %s108_s22), 2  ;;  %p129_p4 = scmp.ne.s32.totalorder %s1298_s28, %s1294_s27 }
  0x78   : > { %s112_s17 = ssub.s32 %s2030_s21, %s2032_s22  ;;  %s350_s25 = sand.u32 1, %s1302_s29  }
  0x79   : > { %s113_s3 = sor.u32 %s112_s17, %s1594_s14  ;;  %p1973_p0 = scmp.eq.s32.totalorder %s1346_s18, 0 }
  0x7a   : > { %p114_p11 = scmp.eq.s32.totalorder %s113_s3, 0  ;;  %p1974_p12 = scmp.eq.s32.totalorder %s1479_s19, 0 }
  0x7b   : > { %p125_p2 = por %p123_p3, %p1973_p0  ;;  %s905_s12 = sshll.u32 %s350_s25, 3 }
  0x7c   : > { %p1682_p5 = por %p129_p4, %p1974_p12  ;;  %s360_s9 = sadd.s32 %s1524_s30, %s2030_s21 }
  0x7d   : > { %s1688_s20 = scalar_select %p114_p11, %s1302_s29, %s116_s1  }
  0x7e   : > { %s1975_s2 = scalar_select %p1682_p5, 1, 0 }
  0x7f   : > { %s906_s4 = sshll.u32 %s360_s9, 7  ;;  %s1976_s6 = sld [smem:[#allocation27_spill]] }
  0x80   : > { %s352_s14 = scalar_lea.vmem [#allocation8], %s905_s12  ;;  %p1977_p13 = scmp.lt.s32.totalorder %s1346_s18, 6 }
  0x81   : > { %s364_s15 = sshll.u32 %s352_s14, 4  ;;  %s1695_s15 = int_to_ptr.vmem [resolvable:$true] %s364_s15 }
  0x82   : > { %p1699_p9 = pnand %p1977_p13, %p125_p2 }
  0x84   : > { %p1164_p6 = pneg %p1699_p9 }
  0x85   : > { %s1693_s27 = scalar_lea.hbm %s1976_s6, %s906_s4  ;;  %s1167_s1 = scalar_lea.hbm %s1976_s6, 768 }
  0x86   : > { %s1162_s30 = scalar_lea.hbm %s1693_s27, 128  ;;  %p1168_p3 = scmp.lt.u32.totalorder %s1693_s27, %s1976_s6 }
  0x87   : > { %p1163_p10 = scmp.ne.s32.totalorder %s1693_s27, %s1162_s30  ;;  %p1169_p4 = scmp.lt.u32.totalorder %s1167_s1, %s1162_s30 }
  0x88   : > { %p1171_p2 = scmp.lt.u32.totalorder %s1162_s30, %s1693_s27 }
  0x89   : > { %p1165_p7 = pnand %p1164_p6, %p1163_p10  ;;  %p1170_p0 = por %p1169_p4, %p1168_p3 }
  0x8b   : > { %p1166_p1 = pneg %p1165_p7  ;;  %p1172_p11 = por %p1171_p2, %p1170_p0 }
  0x8d   : > { %p1173_p12 = pnand %p1172_p11, %p1166_p1 }
  0x8f   : > { %1176 = shalt.err (!%p1173_p12)
}
  0x90   : > { %s1177_s3 = scalar_lea.vmem %s1695_s15, 128  ;;  %s1350_s12 = smov [#allocation8]  }
  0x91   : > { %p1178_p13 = scmp.ne.s32.totalorder %s1695_s15, %s1177_s3  ;;  %s1182_s9 = sshll.u32 %s1350_s12, 4  ;;  %s1183_s9 = int_to_ptr.vmem [resolvable:$false] %s1182_s9 }
  0x92   : > { %s1184_s4 = scalar_lea.vmem %s1183_s9, 256  ;;  %p1185_p5 = scmp.lt.s32.totalorder %s1695_s15, %s1183_s9 }
  0x93   : > { %p1180_p10 = pnand %p1178_p13, %p1164_p6  ;;  %p1186_p3 = scmp.lt.s32.totalorder %s1184_s4, %s1177_s3 }
  0x95   : > { %p1181_p7 = pneg %p1180_p10  ;;  %p1187_p4 = por %p1186_p3, %p1185_p5 }
  0x97   : > { %p1188_p0 = pnand %p1187_p4, %p1181_p7 }
  0x99   : > { %1191 = shalt.err (!%p1188_p0)
}
  0x9a   : > { %s1979_s23 = sld [smem:[#allocation23_spill]]  ;;  %383 = sbr.rel (%p1579_p8) target bundleno = 1263 (0x4ef), region = 52 }
  0x9b   : > { %s1981_s14 = sld [smem:[#allocation16_spill]] (!%p1579_p8)  ;;  %p1982_p5 = scmp.ne.s32.totalorder (!%p1579_p8), %s1968_s5, 0 }
  0xa0   : > { %971 = dma.hbm_to_vmem [thread:$0]  (!%p1699_p9), %s1693_s27, 128, %s1695_s15, %s1979_s23  }
  0xa1   : > { %s385_s30 = sand.u32 1, %s1981_s14  }
  0xa2   : > { %s1732_s21 = sshll.u32 %s385_s30, 3  ;;  %s386_s22 = scalar_lea.sflag [#allocation4], %s385_s30 }
  0xa3   : > { %s389_s1 = scalar_lea.vmem [#allocation3], %s1732_s21 }
  0xa4   : > { %1277 = dma.done.wait (%p1982_p5), %s386_s22, 128  }
  0xa5   : > { %1279 = vsyncadd (%p1982_p5), %s386_s22, 4294967168  ;;  %s1983_s11 = sld [smem:[#allocation15_spill]]  ;;  %s1984_s27 = sld [smem:[#allocation20_spill]] }
  0xa6   : > { %s394_s15 = sand.u32 1, %s1479_s19  }
  0xa7   : > { %s395_s3 = scalar_lea.sflag [#allocation7], %s394_s15 }
  0xab   : > { %s396_s17 = sand.u32 1, %s1983_s11   ;;  %p1985_p8 = scmp.ne.s32.totalorder %s1984_s27, 0 }
  0xac   : > { %s1743_s25 = sshll.u32 %s396_s17, 3 }
  0xad   : > { %s398_s12 = scalar_lea.vmem [#allocation6], %s1743_s25 }
  0xae   : > { %1281 = dma.done.wait (%p1985_p8), %s395_s3, 128  }
  0xaf   : > { %1283 = vsyncadd (%p1985_p8), %s395_s3, 4294967168  ;;  %s405_s5 = sand.u32 1, %s1298_s28   ;;  %p1986_p9 = scmp.ne.s32.totalorder %s1975_s2, 0 }
  0xb0   : > { %s1751_s9 = sshll.u32 %s405_s5, 3 }
  0xb1   : > { %s407_s4 = scalar_lea.vmem [#allocation8], %s1751_s9 }
  0xb2   : > { %1285 = dma.done.wait (%p1986_p9), %s395_s3, 128  }
  0xb3   : > { %1287 = vsyncadd (%p1986_p9), %s395_s3, 4294967168  ;;  %s1987_s19 = sld [smem:[#allocation18_spill]]  ;;  %s1988_s23 = sld [smem:[#allocation17_spill]]  ;;  %v1767_v0 = vld [vmem:[%s398_s12] sm:$0xff] }
  0xb4   : > { %s1989_s27 = sld [smem:[#allocation28_spill]]  ;;  %s456_s3 = scalar_lea.vmem [#allocation9], %s1743_s25 }
  0xb9   : > { %p463_p6 = scmp.lt.s32.totalorder %s1987_s19, 1  ;;  %p465_p1 = scmp.lt.s32.totalorder %s1988_s23, 2 }
  0xba   : > { %s1761_s26 = sshll.u32 %s1988_s23, 7  ;;  %p913_p2 = scmp.ne.s32.totalorder %s1988_s23, 0 }
  0xbb   : > { %s2034_s19 = smov (!%p463_p6, %s1987_s19), 1  ;;  %vm476_vm0 = vcmask (!%p913_p2), 31744   ;;  %v1351_v1 = vmov (!%p913_p2), 0.0  }
  0xbc   : > { %s466_s14 = scalar_select %p465_p1, %s1988_s23, 2 }
  0xbd   : > { %s952_s30 = smul.u32 3, %s2034_s19  ;;  %477 = vst.msk [vmem:[#allocation2] sm:$0xff] (!%p913_p2), %vm476_vm0, %v1351_v1 }
  0xbe   : > { %475 = sbr.rel (%p913_p2) target bundleno = 197 (0xc5), region = 68 }
  0xbf   : > { %s1765_s22 = sadd.s32 %s952_s30, %s466_s14 }
  0xc0   : > { %s469_s15 = scalar_lea.vmem %s1989_s27, %s1765_s22 }
  0xc5 PF: > { %s1990_s5 = sld [smem:[#allocation17_spill]] }
  0xcb   : > { %p914_p11 = scmp.le.s32.totalorder %s1990_s5, 0 }
  0xcc   : > { %v482_v2 = vld [vmem:[%s389_s1] sm:$0xff] (!%p914_p11)  ;;  %s1352_s12 = smov (!%p914_p11), 4   ;;  %vm487_vm1 = vcmask (!%p914_p11), 31744  }
  0xcd   : > { %481 = sbr.rel (%p914_p11) target bundleno = 321 (0x141), region = 72  ;;  %484 = vrot.lane.b32.xlu0 (!%p914_p11), %v482_v2, %s1352_s12 }
 0x13f   : > { %v485_v3 = vpop.permute.xlu0 %484 }
 0x140   : > { %488 = vst.msk [vmem:[#allocation2] sm:$0xff] %vm487_vm1, %v485_v3 }
 0x141 PF: > { %495 = vst [vmem:[#allocation2 + $0x8] sm:$0xff] %v1767_v0  ;;  %s1780_s19 = sadd.s32 128, %s1761_s26  ;;  %s1353_s23 = smov 4   ;;  %vm493_vm2 = vcmask 1047584  }
 0x142   : > { %490 = vrot.lane.b32.xlu0 %v1767_v0, %s1353_s23  ;;  %p915_p12 = scmp.le.s32.totalorder %s1780_s19, 300 }
 0x143   : > { %s1354_s21 = smov (!%p915_p12), 124   ;;  %v501_v5 = vlaneseq (!%p915_p12)  ;;  %s503_s1 = sadd.s32 (!%p915_p12), 4, %s1761_s26  ;;  %vm513_vm4 = vcmask (!%p915_p12), 1014784  }
 0x144   : > { %v504_v7 = vstv (!%p915_p12), %s503_s1 }
 0x145   : > { %v502_v6 = vand.u32 (!%p915_p12), 127, %v501_v5 }
 0x146   : > { %509 = vrot.lane.b32.xlu0 (!%p915_p12), %v1767_v0, %s1354_s21 }
 0x147   : > { %v505_v8 = vadd.s32 (!%p915_p12), %v504_v7, %v502_v6 }
 0x149   : > { %vm506_vm3 = vcmp.lt.s32.totalorder (!%p915_p12), %v505_v8, 300 }
 0x1af   : > { %500 = sbr.rel (%p915_p12) target bundleno = 443 (0x1bb), region = 76 }
 0x1b4   : > { %v491_v4 = vpop.permute.xlu0 %490 }
 0x1b5   : > { %494 = vst.msk [vmem:[#allocation2] sm:$0xff] %vm493_vm2, %v491_v4 }
 0x1b8   : > { %v510_v9 = vpop.permute.xlu0 %509 }
 0x1b9   : > { %v512_v10 = vsel %vm506_vm3, %v510_v9, 0.0 }
 0x1ba   : > { %514 = vst.msk [vmem:[#allocation2 + $0x10] sm:$0xff] %vm513_vm4, %v512_v10 }
 0x1bb PF: > { %p916_p13 = scmp.gt.s32.totalorder %s1780_s19, 300 }
 0x1bc   : > { %s1355_s14 = smov (!%p916_p13), 124   ;;  %vm522_vm5 = vcmask (!%p916_p13), 1014784  }
 0x1bd   : > { %518 = sbr.rel (%p916_p13) target bundleno = 561 (0x231), region = 80  ;;  %519 = vrot.lane.b32.xlu0 (!%p916_p13), %v1767_v0, %s1355_s14 }
 0x22f   : > { %v520_v11 = vpop.permute.xlu0 %519 }
 0x230   : > { %523 = vst.msk [vmem:[#allocation2 + $0x10] sm:$0xff] %vm522_vm5, %v520_v11 }
 0x231 PF: > { %s524_s30 = sadd.s32 132, %s1761_s26 }
 0x232   : > { %p917_p10 = scmp.le.s32.totalorder %s524_s30, 300 }
 0x233   : > { %v529_v12 = vlaneseq (!%p917_p10)  ;;  %v531_v13 = vstv (!%p917_p10), %s1780_s19  ;;  %v534_v16 = vld [vmem:[%s407_s4] sm:$0xff] (!%p917_p10)  ;;  %s1356_s2 = smov (!%p917_p10), 124   ;;  %vm542_vm7 = vcmask (!%p917_p10), 1048544  }
 0x234   : > { %528 = sbr.rel (%p917_p10) target bundleno = 687 (0x2af), region = 84 }
 0x235   : > { %v530_v14 = vand.u32 (!%p917_p10), 127, %v529_v12 }
 0x237   : > { %v532_v15 = vadd.s32 (!%p917_p10), %v531_v13, %v530_v14 }
 0x239   : > { %vm533_vm6 = vcmp.lt.s32.totalorder (!%p917_p10), %v532_v15, 300 }
 0x23a   : > { %v537_v17 = vsel (!%p917_p10), %vm533_vm6, %v534_v16, 0.0 }
 0x23b   : > { %539 = vrot.lane.b32.xlu0 %v537_v17, %s1356_s2 }
 0x2ad   : > { %v540_v18 = vpop.permute.xlu0 %539 }
 0x2ae   : > { %543 = vst.msk [vmem:[#allocation2 + $0x10] sm:$0xff] %vm542_vm7, %v540_v18 }
 0x2af PF: > { %p918_p7 = scmp.gt.s32.totalorder %s524_s30, 300 }
 0x2b0   : > { %v548_v19 = vld [vmem:[%s407_s4] sm:$0xff] (!%p918_p7)  ;;  %s1357_s26 = smov (!%p918_p7), 124   ;;  %vm553_vm8 = vcmask (!%p918_p7), 1048544  }
 0x2b1   : > { %547 = sbr.rel (%p918_p7) target bundleno = 805 (0x325), region = 88  ;;  %550 = vrot.lane.b32.xlu0 (!%p918_p7), %v548_v19, %s1357_s26 }
 0x323   : > { %v551_v20 = vpop.permute.xlu0 %550 }
 0x324   : > { %554 = vst.msk [vmem:[#allocation2 + $0x10] sm:$0xff] %vm553_vm8, %v551_v20 }
 0x325 PF: > { %v556_v21 = vld [vmem:[#allocation2] sm:$0xff]  ;;  %v557_v22 = vld [vmem:[#allocation2 + $0x8] sm:$0xff]  ;;  %v1358_v23 = vmov 0.0|0.0   ;;  %vm1359_vm9 = vmmov 0   ;;  %v1360_v25 = vmov 0.0   ;;  %s1991_s5 = sld [smem:[#allocation30_spill]] }
 0x326   : > { %946 = vmatprep.subr.bf16.mxu0 %v1358_v23  ;;  %v947_v24 = vpack.c.bf16 %v557_v22, %v556_v21  ;;  %938 = vmatprep.mubr.msk.f32.mxu0 %vm1359_vm9, %v1360_v25  ;;  %v1361_v27 = vmov 0   ;;  %s1992_s12 = sld [smem:[#allocation32_spill]]  ;;  %s1994_s1 = sld [smem:[#allocation29_spill]]  ;;  %vm565_vm10 = vcmask 195584   ;;  %vm647_vm11 = vcmask 64512  }
 0x327   : > { %1101 = vset.pattern.permute.xlu0 %v1361_v27  ;;  %941 = vmatprep.subr.mxu1 %v1360_v25  ;;  %s1993_s19 = sld [smem:[#allocation18_spill]]  ;;  %s1995_s14 = sld [smem:[#allocation17_spill]]  ;;  %v921_v41 = vld [vmem:[%s469_s15] ss:$0 sm:$0xff] }
 0x328   : > { %948 = vmatpush3.bf16.msra.mxu0 %v947_v24  ;;  %943 = vmatprep.mubr.msk.f32.mxu1 %vm1359_vm9, %v1360_v25  ;;  %s1996_s26 = sld [smem:[#allocation31_spill]]  ;;  %s1998_s9 = sld [smem:[#allocation21_spill]] }
 0x329   : > { %936 = vmatprep.subr.mxu0 %v1360_v25  ;;  %s732_s22 = scalar_lea.sflag [#allocation5], %s396_s17 }
 0x32b   : > { %v559_v26 = vld [vmem:[%s1991_s5] sm:$0xff]  ;;  %v558_v28 = vld [vmem:[#allocation2 + $0x10] sm:$0xff] }
 0x32c   : > { %562 = vperm.xlu0 %1101, %v559_v26   ;;  %v641_v29 = vld [vmem:[%s1992_s12] sm:$0xff]  ;;  %937 = vmatpush3.msra.mxu0 %v558_v28 }
 0x32d   : > { %v555_v30 = vld [vmem:[%s1994_s1] sm:$0xff]  ;;  %s953_s27 = smul.u32 3, %s1993_s19  ;;  %s747_s1 = sshll.u32 %s456_s3, 4  ;;  %s1821_s1 = int_to_ptr.vmem [resolvable:$true] %s747_s1 }
 0x32e   : > { %939 = vmatmul.mubr.msk.f32.vlgmr.msra.gmra.mrb[0].mxu0 %vm565_vm10, %v555_v30  ;;  %v640_v36 = vld [vmem:[%s1996_s26] sm:$0xff]  ;;  %s2000_s19 = sld [smem:[#allocation33_spill]]  ;;  %s1192_s15 = scalar_lea.vmem %s1821_s1, 128 }
 0x32f   : > { %s743_s5 = sadd.s32 %s1995_s14, %s953_s27  ;;  %p1193_p3 = scmp.ne.s32.totalorder %s1821_s1, %s1192_s15 }
 0x330   : > { %644 = vperm.xlu0 %1101, %v641_v29   ;;  %s923_s21 = sshll.u32 %s743_s5, 7  ;;  %p2001_p4 = scmp.ne.s32.totalorder %s1998_s9, 0 }
 0x331   : > { %s1362_s26 = smov [#allocation9]  }
 0x332   : > { %p1194_p0 = pnand %p1193_p3, %p2001_p4  ;;  %s1196_s27 = sshll.u32 %s1362_s26, 4  ;;  %s1197_s27 = int_to_ptr.vmem [resolvable:$false] %s1196_s27 }
 0x333   : > { %s1198_s5 = scalar_lea.vmem %s1197_s27, 256  ;;  %p1199_p8 = scmp.lt.s32.totalorder %s1821_s1, %s1197_s27 }
 0x334   : > { %s1819_s14 = scalar_lea.hbm %s2000_s19, %s923_s21  ;;  %p1195_p5 = pneg %p1194_p0 }
 0x335   : > { %p1200_p9 = scmp.lt.s32.totalorder %s1198_s5, %s1192_s15 }
 0x337   : > { %p1201_p6 = por %p1200_p9, %p1199_p8 }
 0x339   : > { %p1202_p1 = pnand %p1201_p6, %p1195_p5 }
 0x3ab   : > { %v563_v31 = vpop.permute.xlu0 %562 }
 0x3af   : > { %v645_v37 = vpop.permute.xlu0 %644 }
 0x401   : > { %v635_v32 = vpop.f32.mrb[0].mxu0 }
 0x402   : > { %v636_v33 = vadd.f32 %v635_v32, %v563_v31  ;;  %v940_v34 = vpop.f32.mrb[1].mxu0 }
 0x404   : > { %v639_v35 = vmax.f32 %v636_v33, 0.0 }
 0x406   : > { %942 = vmatpush3.msra.mxu1 %v639_v35 }
 0x407   : > { %944 = vmatmul.mubr.msk.f32.vlgmr.msra.gmra.mrb[0].mxu1 %vm647_vm11, %v640_v36 }
 0x4da   : > { %v717_v38 = vpop.f32.mrb[0].mxu1 }
 0x4db   : > { %v718_v39 = vadd.f32 %v717_v38, %v645_v37  ;;  %v945_v40 = vpop.f32.mrb[1].mxu1 }
 0x4dd   : > { %v721_v42 = vadd.f32 %v718_v39, %v1767_v0 }
 0x4df   : > { %v729_v43 = vmul.f32 %v921_v41, %v721_v42 }
 0x4e1   : > { %730 = vst [vmem:[%s456_s3] sm:$0xff] %v729_v43 }
 0x4e2   : > { %1205 = shalt.err (!%p1202_p1)
}
 0x4e3   : > { %s1206_s17 = scalar_lea.hbm %s1819_s14, 128  ;;  %s1210_s11 = scalar_lea.hbm %s2000_s19, 768 }
 0x4e4   : > { %p1207_p2 = scmp.ne.s32.totalorder %s1819_s14, %s1206_s17  ;;  %p1211_p13 = scmp.lt.u32.totalorder %s1819_s14, %s2000_s19 }
 0x4e5   : > { %p1212_p10 = scmp.lt.u32.totalorder %s1210_s11, %s1206_s17  ;;  %p1214_p3 = scmp.lt.u32.totalorder %s1206_s17, %s1819_s14 }
 0x4e6   : > { %p1208_p11 = pnand %p1207_p2, %p2001_p4 }
 0x4e7   : > { %p1213_p7 = por %p1212_p10, %p1211_p13 }
 0x4e8   : > { %p1209_p12 = pneg %p1208_p11 }
 0x4e9   : > { %p1215_p0 = por %p1214_p3, %p1213_p7 }
 0x4eb   : > { %p1216_p5 = pnand %p1215_p0, %p1209_p12 }
 0x4ed   : > { %1219 = shalt.err (!%p1216_p5)
}
 0x4ee   : > { %960 = dma.vmem_to_hbm [thread:$0]  (%p2001_p4), %s1821_s1, 128, %s1819_s14, %s732_s22  }
 0x4ef PF: > { %s2002_s23 = sld [smem:[#allocation14_spill]]  ;;  %s2003_s21 = sld [smem:[#allocation22_spill]] }
 0x4f0   : > { %p977_p8 = scmp.ge.s32.totalorder %s1346_s18, 2 }
 0x4f5   : > { %s759_s30 = sand.u32 1, %s2002_s23   ;;  %p2004_p9 = scmp.ne.s32.totalorder %s2003_s21, 0 }
 0x4f6   : > { %s760_s2 = scalar_lea.sflag [#allocation5], %s759_s30 }
 0x4f7   : > { %p973_p6 = pnand %p977_p8, %p2004_p9 }
 0x4f9   : > { %1289 = dma.done.wait (!%p973_p6), %s760_s2, 128  }
 0x4fa   : > { %1291 = vsyncadd (!%p973_p6), %s760_s2, 4294967168  ;;  %s27_s18 = sadd.s32 1, %s1346_s18   ;;  %s2006_s30 = sld [smem:[#allocation15_spill]] }
 0x4fb   : > { %p1853_p1 = scmp.ge.s32.totalorder %s27_s18, 8   ;;  %s2007_s11 = sld [smem:[#allocation16_spill]] }
 0x4fc   : > { %s2008_s1 = sld [smem:[#allocation19_spill]]  ;;  %s2009_s17 = sld [smem:[#allocation25_spill]] }
 0x4fd   : > { %s2011_s27 = smov %s1298_s28  ;;  %s2012_s28 = smov %s1302_s29 }
 0x4fe   : > { %s2013_s29 = smov %s1688_s20  ;;  %s2014_s9 = smov %s1314_s10 }
 0x4ff   : > { %s2015_s10 = smov %s1625_s8  ;;  %s2016_s12 = smov %s1326_s13 }
 0x500   : > { %s2017_s13 = smov %s1619_s7  ;;  %s2018_s14 = smov %s1338_s16 }
 0x501   : > { %s2020_s16 = smov %s1493_s24  ;;  %26 = sbr.rel (!%p1853_p1) target bundleno = 21 (0x15), region = 148 }
 0x502   : > { %s2019_s15 = smov %s2008_s1 }
 0x508   :  { %765 = vsyncpa [#allocation4], 1 }
 0x509   :  { %767 = vsyncpa [#allocation4 + $0x1], 1 }
 0x50a   :  { %768 = vsyncpa [#allocation7], 1 }
 0x50b   :  { %770 = vsyncpa [#allocation7 + $0x1], 1 }
 0x50c   :  { %771 = vsyncpa [#allocation5], 1 }
 0x50d   :  { %773 = vsyncpa [#allocation5 + $0x1], 1 }

</bundles_post_ra>
